<compile_context>
chip_gen: v6e
topology: v6e:2x2x1
jax: 0.10.0
libtpu: 0.0.40
codegen_flags: <defaults>
</compile_context>

<pallas_src>
import jax
import jax.numpy as jnp
from jax.experimental import pallas as pl
from jax.experimental.pallas import tpu as pltpu

_LANE = 128
_TILE_ROWS = 512                       # (512, 128) f32 = 256 KiB per plane per step
_TILE_ELEMS = _TILE_ROWS * _LANE       # 65536 points per grid step
_FAST_PATH_MAX = _TILE_ELEMS           # below ~one tile: skip pallas_call entirely


def _rosenbrock2_kernel(x_ref, f_ref):
    # x_ref: (2, TILE_ROWS, LANE) f32 — x1 plane and x2 plane.
    # f_ref: (TILE_ROWS, LANE) f32.
    x1 = x_ref[0]
    x2 = x_ref[1]
    one_minus = 1.0 - x1
    resid = x2 - x1 * x1
    f_ref[...] = one_minus * one_minus + 100.0 * (resid * resid)


def _rosenbrock2_jnp(xs):
    """Fused XLA elementwise path for small batches."""
    x1 = xs[:, 0]
    x2 = xs[:, 1]
    return (1.0 - x1) ** 2 + 100.0 * (x2 - x1 * x1) ** 2


def rosenbrock2_batched(xs, use_pallas=None):
    """xs: (B, 2) float32 points. Returns (B,) f32 of Rosenbrock values."""
    xs = jnp.asarray(xs, jnp.float32)
    b = xs.shape[0]

    if use_pallas is None:
        use_pallas = b >= _FAST_PATH_MAX
    if not use_pallas:
        return _rosenbrock2_jnp(xs)

    # >= 2 grid steps so ("parallel",) can shard across v7x's 2 TensorCores.
    n_tiles = max(2, pl.cdiv(b, _TILE_ELEMS))
    padded = n_tiles * _TILE_ELEMS
    rows = padded // _LANE

    # (B, 2) -> (2, B) -> single fused pad -> (2, rows, LANE).
    # Padded lanes compute f(0, 0) = 1 and are sliced off below.
    xt = jnp.pad(xs.T, ((0, 0), (0, padded - b)))
    x = xt.reshape(2, rows, _LANE)

    cost = pl.CostEstimate(
        flops=7 * padded,
        transcendentals=0,
        bytes_accessed=3 * 4 * padded,   # 2 input planes + 1 output plane, f32
    )

    f_planes = pl.pallas_call(
        _rosenbrock2_kernel,
        out_shape=jax.ShapeDtypeStruct((rows, _LANE), jnp.float32),
        grid_spec=pltpu.PrefetchScalarGridSpec(
            num_scalar_prefetch=0,
            grid=(n_tiles,),
            in_specs=[pl.BlockSpec((2, _TILE_ROWS, _LANE), lambda i: (0, i, 0))],
            out_specs=pl.BlockSpec((_TILE_ROWS, _LANE), lambda i: (i, 0)),
        ),
        compiler_params=pltpu.CompilerParams(
            dimension_semantics=("parallel",),
        ),
        cost_estimate=cost,
    )(x)

    return f_planes.reshape(-1)[:b]


def rosenbrock2(x):
    """x: (2,) float32 vector. Returns scalar f32 (matches the nn.Module forward).

    B=1 is latency-dominated; route through the fused XLA fast path so the 7
    flops can fuse into surrounding optimizer math.
    """
    x = jnp.asarray(x, jnp.float32)
    return _rosenbrock2_jnp(x[None, :])[0]


def rosenbrock2_ref(x):
    return (1.0 - x[0]) ** 2 + 100.0 * (x[1] - x[0] ** 2) ** 2


if __name__ == "__main__":
    # Single-point path (module semantics: x of shape (2,) -> scalar).
    x = jax.random.normal(jax.random.PRNGKey(0), (2,), dtype=jnp.float32)
    f = rosenbrock2(x)
    jax.block_until_ready(f)
    f_ref = rosenbrock2_ref(x)
    assert jnp.allclose(f, f_ref, rtol=1e-6, atol=1e-6), (f, f_ref)

    # Small batch: auto-routes to the fused XLA fast path.
    xs_small = jax.random.normal(jax.random.PRNGKey(1), (5, 2), dtype=jnp.float32)
    fs_small = rosenbrock2_batched(xs_small)
    jax.block_until_ready(fs_small)
    fs_small_ref = jax.vmap(rosenbrock2_ref)(xs_small)
    assert jnp.allclose(fs_small, fs_small_ref, rtol=1e-6, atol=1e-6)

    # Pallas path exercised explicitly (modest batch, padded to 2 grid steps).
    xs = jax.random.normal(jax.random.PRNGKey(2), (1000, 2), dtype=jnp.float32)
    fs = rosenbrock2_batched(xs, use_pallas=True)
    jax.block_until_ready(fs)
    fs_ref = jax.vmap(rosenbrock2_ref)(xs)
    assert jnp.allclose(fs, fs_ref, rtol=1e-5, atol=1e-5)

    print("KERNEL_OK")
</pallas_src>

<mosaic_0001>
module attributes {stable_mosaic.version = 11 : i64} {
  func.func @_rosenbrock2_kernel(%arg0: i32, %arg1: memref<2x512x128xf32, #tpu.memory_space<vmem>>, %arg2: memref<512x128xf32, #tpu.memory_space<vmem>>) attributes {dimension_semantics = [#tpu.dimension_semantics<parallel>], iteration_bounds = array<i64: 2>, scalar_prefetch = 0 : i64, scratch_operands = 0 : i64, tpu.core_type = #tpu.core_type<tc>, window_params = [{transform_indices = @transform_0, window_bounds = array<i64: 2, 512, 128>}, {transform_indices = @transform_1, window_bounds = array<i64: 512, 128>}]} {
    %c0 = arith.constant 0 : index
    %c0_0 = arith.constant 0 : index
    %c0_1 = arith.constant 0 : index
    %0 = vector.load %arg1[%c0, %c0_0, %c0_1] : memref<2x512x128xf32, #tpu.memory_space<vmem>>, vector<1x512x128xf32>
    %1 = vector.shape_cast %0 : vector<1x512x128xf32> to vector<512x128xf32>
    %c1 = arith.constant 1 : index
    %c0_2 = arith.constant 0 : index
    %c0_3 = arith.constant 0 : index
    %2 = vector.load %arg1[%c1, %c0_2, %c0_3] : memref<2x512x128xf32, #tpu.memory_space<vmem>>, vector<1x512x128xf32>
    %3 = vector.shape_cast %2 : vector<1x512x128xf32> to vector<512x128xf32>
    %cst = arith.constant 1.000000e+00 : f32
    %4 = vector.broadcast %cst : f32 to vector<512x128xf32>
    %5 = arith.subf %4, %1 : vector<512x128xf32>
    %6 = arith.mulf %1, %1 : vector<512x128xf32>
    %7 = arith.subf %3, %6 : vector<512x128xf32>
    %8 = arith.mulf %5, %5 : vector<512x128xf32>
    %9 = arith.mulf %7, %7 : vector<512x128xf32>
    %cst_4 = arith.constant 1.000000e+02 : f32
    %10 = vector.broadcast %cst_4 : f32 to vector<512x128xf32>
    %11 = arith.mulf %10, %9 : vector<512x128xf32>
    %12 = arith.addf %8, %11 : vector<512x128xf32>
    %c0_5 = arith.constant 0 : index
    %c0_6 = arith.constant 0 : index
    %13 = vector.load %arg2[%c0_5, %c0_6] : memref<512x128xf32, #tpu.memory_space<vmem>>, vector<512x128xf32>
    tpu.vector_store %arg2[%c0_5, %c0_6], %12 {strides = array<i32>} : memref<512x128xf32, #tpu.memory_space<vmem>>, vector<512x128xf32>,
    return
  }
  func.func @transform_0(%arg0: i32) -> (i32, i32, i32) {
    %c0_i32 = arith.constant 0 : i32
    %c0_i32_0 = arith.constant 0 : i32
    %c0_i32_1 = arith.constant 0 : i32
    return %c0_i32, %arg0, %c0_i32_0 : i32, i32, i32
  }
  func.func @transform_1(%arg0: i32) -> (i32, i32) {
    %c0_i32 = arith.constant 0 : i32
    %c0_i32_0 = arith.constant 0 : i32
    return %arg0, %c0_i32 : i32, i32
  }
}

</mosaic_0001>

<bundles_post_ra>
// kernel: tpu_custom_call.1
= control target key start
LH: loop header
LB: loop body
LE: loop exit
PB: predicated region body
PF: predicated region fallthrough
CT: control target
= control target key end

     0   :  { %6 = vsyncpa [#allocation3], 0  ;;  %s1453_s0 = inlined_call_operand.hbm [shape: f32[2,1024,128], index: 0, kind: input, shape index: {}]   ;;  %s1454_s1 = inlined_call_operand.hbm [shape: f32[1024,128], index: 1, kind: output, shape index: {}]  }
   0x1   :  { %8 = vsyncpa [#allocation3 + $0x1], 0 }
   0x2   :  { %9 = vsyncpa [#allocation4], 0 }
   0x3   :  { %11 = vsyncpa [#allocation4 + $0x1], 0  ;;  %s1113_s6 = smov 0   ;;  %s1115_s7 = smov 0  }
   0x4   :  { %s1117_s8 = smov 0   ;;  %s1119_s9 = smov 0  }
   0x5 LB: > { %s1134_s10 = sadd.s32 4294967295, %s1092_s9   ;;  %s890_s11 = sadd.s32 4294967294, %s1092_s9   ;;  %s1092_s9 = sphi %s1119_s9, %s1462_s9   ;;  %s1088_s8 = sphi %s1117_s8, %s1461_s8   ;;  %s1084_s7 = sphi %s1115_s7, %s1460_s7   ;;  %s1080_s6 = sphi %s1113_s6, %s1459_s6  }
   0x6   : > { %s1138_s12 = sadd.s32 1, %s1092_s9   ;;  %s24_s13 = sadd.s32 1, %s1088_s8 }
   0x7   : > { %s21_s14 = ssub.s32 %s1092_s9, %s1138_s12  ;;  %p31_p0 = scmp.ne.s32.totalorder %s1088_s8, %s1084_s7 }
   0x8   : > { %p22_p1 = scmp.eq.s32.totalorder %s21_s14, 0  ;;  %p32_p2 = scmp.eq.s32.totalorder %s1092_s9, 0 }
   0x9   : > { %p37_p3 = scmp.ne.s32.totalorder %s1084_s7, %s1080_s6  ;;  %p38_p4 = scmp.eq.s32.totalorder %s1134_s10, 0 }
   0xa   : > { %s1150_s15 = scalar_select %p22_p1, %s1088_s8, %s24_s13  }
   0xb   : > { %p1152_p5 = por %p32_p2, %p31_p0  ;;  %p1156_p6 = por %p38_p4, %p37_p3 }
   0xc   : > { %p61_p7 = scmp.eq.s32.totalorder %s1134_s10, 1  ;;  %p67_p8 = scmp.eq.s32.totalorder %s890_s11, 1 }
   0xd   : > { %p892_p11 = scmp.ge.s32.totalorder %s1092_s9, 2 }
   0xe   : > { %p1161_p9 = por %p61_p7, %p31_p0  ;;  %p1165_p10 = por %p67_p8, %p37_p3 }
   0xf   : > { %83 = sbr.rel (%p892_p11) target bundleno = 33 (0x21), region = 16 }
  0x14   : > { %s87_s20 = sand.u32 1, %s1088_s8   ;;  %s970_s21 = sshll.u32 %s1092_s9, 13 }
  0x15   : > { %s893_s22 = sshll.u32 %s87_s20, 10  ;;  %s97_s25 = scalar_lea.hbm %s1453_s0, %s970_s21 }
  0x16   : > { %s972_s26 = scalar_select %p1152_p5, [#allocation0], [#allocation8] }
  0x17   : > { %s91_s27 = scalar_lea.vmem [#allocation2], %s893_s22  ;;  %s1094_s30 = smov 16384  }
  0x18   : > { %s110_s28 = sshll.u32 %s91_s27, 4  ;;  %s102_s29 = sld [smem:[%s972_s26]]   ;;  %s111_s28 = int_to_ptr.vmem [resolvable:$true] %s110_s28 }
  0x19   : > { %973 = sst [smem:[#allocation7]] (%p1152_p5), %s1094_s30  ;;  %s1095_s2 = smov 8192  }
  0x1a   : > { %974 = sst [smem:[#allocation7 + $0x1]] (%p1152_p5), %s1095_s2  ;;  %s1096_s3 = smov 64  }
  0x1b   : > { %975 = sst [smem:[#allocation7 + $0x2]] (%p1152_p5), %s1096_s3  ;;  %s1097_s4 = smov 128  }
  0x1c   : > { %976 = sst [smem:[#allocation7 + $0x3]] (%p1152_p5), %s1097_s4  ;;  %s1098_s11 = smov 8  }
  0x1d   : > { %977 = sst [smem:[#allocation7 + $0x4]] (%p1152_p5), %s1097_s4  ;;  %s88_s14 = scalar_lea.sflag [#allocation3], %s87_s20 }
  0x1e   : > { %s896_s5 = sshll.u32 %s102_s29, 26  ;;  %978 = sst [smem:[#allocation7 + $0x5]] (%p1152_p5), %s1098_s11 }
  0x1f   : > { %s897_s13 = sadd.s32 134217728, %s896_s5  ;;  %s1099_s21 = smov 131072  }
  0x20   : > { %979 = dma.general (%p1152_p5), %s97_s25, 16384, %s111_s28, %s88_s14, %s1099_s21, [#allocation7], %s897_s13, 0  }
  0x21 PF: > { %p898_p12 = scmp.ge.s32.totalorder %s1092_s9, 1  ;;  %p131_p13 = scmp.lt.s32.totalorder %s1092_s9, 3 }
  0x23   : > { %p132_p0 = pnand %p898_p12, %p131_p13 }
  0x24   : > { %s1196_s22 = sand.u32 (!%p132_p0), 1, %s1084_s7  }
  0x25   : > { %135 = sbr.rel (%p132_p0) target bundleno = 176 (0xb0), region = 24  ;;  %s899_s23 = sshll.u32 (!%p132_p0), %s1196_s22, 10 }
  0x26   : > { %s138_s24 = scalar_lea.sflag (!%p132_p0), [#allocation3], %s1196_s22  ;;  %s1200_s26 = scalar_lea.vmem (!%p132_p0), [#allocation2], %s899_s23 }
  0x2a   : > { %1071 = dma.done.wait (%p1156_p6), %s138_s24, 16384  }
  0x2b   : > { %1073 = vsyncadd (%p1156_p6), %s138_s24, 4294950912  ;;  %v162_v0 = vld [vmem:[%s1200_s26] sm:$0xff]  ;;  %v163_v2 = vld [vmem:[%s1200_s26 + $0x8] sm:$0xff]  ;;  %s900_s16 = sshll.u32 %s1196_s22, 9  ;;  %s971_s20 = sshll.u32 %s1134_s10, 13 }
  0x2c   : > { %v901_v1 = vld [vmem:[%s1200_s26 + $0x200] sm:$0xff]  ;;  %v291_v3 = vsub.f32 1.0, %v162_v0  ;;  %v355_v4 = vmul.f32 %v162_v0, %v162_v0  ;;  %v902_v5 = vld [vmem:[%s1200_s26 + $0x208] sm:$0xff]  ;;  %v292_v6 = vsub.f32 1.0, %v163_v2  ;;  %v356_v7 = vmul.f32 %v163_v2, %v163_v2  ;;  %v164_v8 = vld [vmem:[%s1200_s26 + $0x10] sm:$0xff]  ;;  %s1226_s17 = scalar_lea.vmem [#allocation5], %s900_s16  ;;  %s1406_s29 = scalar_lea.hbm %s1454_s1, %s971_s20 }
  0x2d   : > { %v903_v9 = vld [vmem:[%s1200_s26 + $0x210] sm:$0xff]  ;;  %v293_v10 = vsub.f32 1.0, %v164_v8  ;;  %v357_v11 = vmul.f32 %v164_v8, %v164_v8  ;;  %v165_v12 = vld [vmem:[%s1200_s26 + $0x18] sm:$0xff]  ;;  %v166_v13 = vld [vmem:[%s1200_s26 + $0x20] sm:$0xff]  ;;  %s817_s25 = sshll.u32 %s1226_s17, 4  ;;  %s804_s10 = scalar_lea.sflag [#allocation4], %s1196_s22  ;;  %s1408_s25 = int_to_ptr.vmem [resolvable:$true] %s817_s25 }
  0x2e   : > { %v419_v14 = vsub.f32 %v901_v1, %v355_v4  ;;  %v483_v15 = vmul.f32 %v291_v3, %v291_v3  ;;  %v420_v16 = vsub.f32 %v902_v5, %v356_v7  ;;  %v904_v17 = vld [vmem:[%s1200_s26 + $0x218] sm:$0xff]  ;;  %v484_v18 = vmul.f32 %v292_v6, %v292_v6  ;;  %v905_v22 = vld [vmem:[%s1200_s26 + $0x220] sm:$0xff]  ;;  %v167_v27 = vld [vmem:[%s1200_s26 + $0x28] sm:$0xff]  ;;  %s1028_s30 = scalar_lea.vmem %s1408_s25, 8192  ;;  %s1100_s2 = smov [#allocation5]  }
  0x2f   : > { %v421_v19 = vsub.f32 %v903_v9, %v357_v11  ;;  %v294_v20 = vsub.f32 1.0, %v165_v12  ;;  %v358_v21 = vmul.f32 %v165_v12, %v165_v12  ;;  %v295_v25 = vsub.f32 1.0, %v166_v13  ;;  %v906_v35 = vld [vmem:[%s1200_s26 + $0x228] sm:$0xff]  ;;  %v168_v37 = vld [vmem:[%s1200_s26 + $0x30] sm:$0xff]  ;;  %v169_v42 = vld [vmem:[%s1200_s26 + $0x38] sm:$0xff]  ;;  %p1029_p1 = scmp.ne.s32.totalorder %s1408_s25, %s1028_s30  ;;  %s1032_s3 = sshll.u32 %s1100_s2, 4  ;;  %s1033_s3 = int_to_ptr.vmem [resolvable:$false] %s1032_s3 }
  0x30   : > { %v547_v23 = vmul.f32 %v419_v14, %v419_v14  ;;  %v548_v24 = vmul.f32 %v420_v16, %v420_v16  ;;  %v359_v26 = vmul.f32 %v166_v13, %v166_v13  ;;  %v485_v28 = vmul.f32 %v293_v10, %v293_v10  ;;  %v907_v46 = vld [vmem:[%s1200_s26 + $0x230] sm:$0xff]  ;;  %v908_v52 = vld [vmem:[%s1200_s26 + $0x238] sm:$0xff]  ;;  %v170_v53 = vld [vmem:[%s1200_s26 + $0x40] sm:$0xff]  ;;  %s1034_s4 = scalar_lea.vmem %s1033_s3, 16384  ;;  %p1035_p4 = scmp.lt.s32.totalorder %s1408_s25, %s1033_s3 }
  0x31   : > { %v549_v29 = vmul.f32 %v421_v19, %v421_v19  ;;  %v422_v30 = vsub.f32 %v904_v17, %v358_v21  ;;  %v486_v31 = vmul.f32 %v294_v20, %v294_v20  ;;  %v296_v36 = vsub.f32 1.0, %v167_v27  ;;  %v909_v61 = vld [vmem:[%s1200_s26 + $0x240] sm:$0xff]  ;;  %v171_v63 = vld [vmem:[%s1200_s26 + $0x48] sm:$0xff]  ;;  %v172_v4 = vld [vmem:[%s1200_s26 + $0x50] sm:$0xff]  ;;  %p1030_p2 = pnand %p1029_p1, %p1161_p9  ;;  %p1036_p5 = scmp.lt.s32.totalorder %s1034_s4, %s1028_s30 }
  0x32   : > { %v611_v32 = vmul.f32 100.0, %v547_v23  ;;  %v612_v33 = vmul.f32 100.0, %v548_v24  ;;  %v423_v34 = vsub.f32 %v905_v22, %v359_v26  ;;  %v487_v40 = vmul.f32 %v295_v25, %v295_v25  ;;  %v910_v8 = vld [vmem:[%s1200_s26 + $0x248] sm:$0xff]  ;;  %v911_v14 = vld [vmem:[%s1200_s26 + $0x250] sm:$0xff]  ;;  %v912_v24 = vld [vmem:[%s1200_s26 + $0x258] sm:$0xff] }
  0x33   : > { %v613_v38 = vmul.f32 100.0, %v549_v29  ;;  %v550_v39 = vmul.f32 %v422_v30, %v422_v30  ;;  %v360_v41 = vmul.f32 %v167_v27, %v167_v27  ;;  %v297_v47 = vsub.f32 1.0, %v168_v37  ;;  %v174_v25 = vld [vmem:[%s1200_s26 + $0x60] sm:$0xff]  ;;  %p1031_p3 = pneg %p1030_p2  ;;  %p1037_p6 = por %p1036_p5, %p1035_p4 }
  0x34   : > { %v675_v43 = vadd.f32 %v611_v32, %v483_v15  ;;  %v676_v44 = vadd.f32 %v612_v33, %v484_v18  ;;  %v551_v45 = vmul.f32 %v423_v34, %v423_v34  ;;  %v361_v51 = vmul.f32 %v168_v37, %v168_v37  ;;  %v173_v15 = vld [vmem:[%s1200_s26 + $0x58] sm:$0xff]  ;;  %v913_v33 = vld [vmem:[%s1200_s26 + $0x260] sm:$0xff] }
  0x35   : > { %v677_v48 = vadd.f32 %v613_v38, %v485_v28  ;;  %v614_v49 = vmul.f32 100.0, %v550_v39  ;;  %v424_v50 = vsub.f32 %v906_v35, %v360_v41  ;;  %v488_v55 = vmul.f32 %v296_v36, %v296_v36  ;;  %v175_v35 = vld [vmem:[%s1200_s26 + $0x68] sm:$0xff]  ;;  %p1038_p7 = pnand %p1037_p6, %p1031_p3 }
  0x36   : > { %739 = vst [vmem:[%s1226_s17] sm:$0xff] %v675_v43  ;;  %740 = vst [vmem:[%s1226_s17 + $0x8] sm:$0xff] %v676_v44  ;;  %v615_v54 = vmul.f32 100.0, %v551_v45  ;;  %v298_v56 = vsub.f32 1.0, %v169_v42  ;;  %v362_v57 = vmul.f32 %v169_v42, %v169_v42  ;;  %v425_v60 = vsub.f32 %v907_v46, %v361_v51  ;;  %v914_v44 = vld [vmem:[%s1200_s26 + $0x268] sm:$0xff]  ;;  %v177_v51 = vld [vmem:[%s1200_s26 + $0x78] sm:$0xff] }
  0x37   : > { %741 = vst [vmem:[%s1226_s17 + $0x10] sm:$0xff] %v677_v48  ;;  %v678_v58 = vadd.f32 %v614_v49, %v486_v31  ;;  %v552_v59 = vmul.f32 %v424_v50, %v424_v50  ;;  %v299_v62 = vsub.f32 1.0, %v170_v53  ;;  %v489_v1 = vmul.f32 %v297_v47, %v297_v47  ;;  %v915_v50 = vld [vmem:[%s1200_s26 + $0x270] sm:$0xff] }
  0x38   : > { %v679_v0 = vadd.f32 %v615_v54, %v487_v40  ;;  %v426_v2 = vsub.f32 %v908_v52, %v362_v57  ;;  %v363_v3 = vmul.f32 %v170_v53, %v170_v53  ;;  %v553_v6 = vmul.f32 %v425_v60, %v425_v60  ;;  %v176_v40 = vld [vmem:[%s1200_s26 + $0x70] sm:$0xff]  ;;  %v916_v60 = vld [vmem:[%s1200_s26 + $0x278] sm:$0xff] }
  0x39   : > { %742 = vst [vmem:[%s1226_s17 + $0x18] sm:$0xff] %v678_v58  ;;  %v616_v5 = vmul.f32 100.0, %v552_v59  ;;  %v490_v7 = vmul.f32 %v298_v56, %v298_v56  ;;  %v300_v9 = vsub.f32 1.0, %v171_v63  ;;  %v491_v12 = vmul.f32 %v299_v62, %v299_v62 }
  0x3a   : > { %743 = vst [vmem:[%s1226_s17 + $0x20] sm:$0xff] %v679_v0  ;;  %v554_v10 = vmul.f32 %v426_v2, %v426_v2  ;;  %v427_v11 = vsub.f32 %v909_v61, %v363_v3  ;;  %v364_v13 = vmul.f32 %v171_v63, %v171_v63  ;;  %v617_v17 = vmul.f32 100.0, %v553_v6  ;;  %v178_v61 = vld [vmem:[%s1200_s26 + $0x80] sm:$0xff] }
  0x3b   : > { %v680_v16 = vadd.f32 %v616_v5, %v488_v55  ;;  %v301_v18 = vsub.f32 1.0, %v172_v4  ;;  %v365_v19 = vmul.f32 %v172_v4, %v172_v4  ;;  %v492_v23 = vmul.f32 %v300_v9, %v300_v9  ;;  %v917_v5 = vld [vmem:[%s1200_s26 + $0x280] sm:$0xff] }
  0x3c   : > { %v618_v20 = vmul.f32 100.0, %v554_v10  ;;  %v555_v21 = vmul.f32 %v427_v11, %v427_v11  ;;  %v428_v22 = vsub.f32 %v910_v8, %v364_v13  ;;  %v681_v26 = vadd.f32 %v617_v17, %v489_v1 }
  0x3d   : > { %744 = vst [vmem:[%s1226_s17 + $0x28] sm:$0xff] %v680_v16  ;;  %v429_v27 = vsub.f32 %v911_v14, %v365_v19  ;;  %v302_v28 = vsub.f32 1.0, %v173_v15  ;;  %v366_v29 = vmul.f32 %v173_v15, %v173_v15  ;;  %v303_v34 = vsub.f32 1.0, %v174_v25  ;;  %v918_v16 = vld [vmem:[%s1200_s26 + $0x288] sm:$0xff] }
  0x3e   : > { %v682_v30 = vadd.f32 %v618_v20, %v490_v7  ;;  %v619_v31 = vmul.f32 100.0, %v555_v21  ;;  %v556_v32 = vmul.f32 %v428_v22, %v428_v22  ;;  %745 = vst [vmem:[%s1226_s17 + $0x30] sm:$0xff] %v681_v26  ;;  %v493_v36 = vmul.f32 %v301_v18, %v301_v18  ;;  %v179_v7 = vld [vmem:[%s1200_s26 + $0x88] sm:$0xff]  ;;  %v919_v22 = vld [vmem:[%s1200_s26 + $0x290] sm:$0xff] }
  0x3f   : > { %v557_v37 = vmul.f32 %v429_v27, %v429_v27  ;;  %v430_v38 = vsub.f32 %v912_v24, %v366_v29  ;;  %v367_v39 = vmul.f32 %v174_v25, %v174_v25  ;;  %v494_v43 = vmul.f32 %v302_v28, %v302_v28 }
  0x40   : > { %746 = vst [vmem:[%s1226_s17 + $0x38] sm:$0xff] %v682_v30  ;;  %v683_v41 = vadd.f32 %v619_v31, %v491_v12  ;;  %v620_v42 = vmul.f32 100.0, %v556_v32  ;;  %v304_v45 = vsub.f32 1.0, %v175_v35  ;;  %v368_v49 = vmul.f32 %v175_v35, %v175_v35  ;;  %v180_v12 = vld [vmem:[%s1200_s26 + $0x90] sm:$0xff]  ;;  %v920_v32 = vld [vmem:[%s1200_s26 + $0x298] sm:$0xff] }
  0x41   : > { %v621_v46 = vmul.f32 100.0, %v557_v37  ;;  %v558_v47 = vmul.f32 %v430_v38, %v430_v38  ;;  %v431_v48 = vsub.f32 %v913_v33, %v367_v39  ;;  %v495_v53 = vmul.f32 %v303_v34, %v303_v34  ;;  %v182_v33 = vld [vmem:[%s1200_s26 + $0xa0] sm:$0xff] }
  0x42   : > { %747 = vst [vmem:[%s1226_s17 + $0x40] sm:$0xff] %v683_v41  ;;  %v684_v52 = vadd.f32 %v620_v42, %v492_v23  ;;  %v305_v54 = vsub.f32 1.0, %v176_v40  ;;  %v369_v55 = vmul.f32 %v176_v40, %v176_v40  ;;  %v432_v59 = vsub.f32 %v914_v44, %v368_v49  ;;  %v181_v23 = vld [vmem:[%s1200_s26 + $0x98] sm:$0xff]  ;;  %v921_v41 = vld [vmem:[%s1200_s26 + $0x2a0] sm:$0xff] }
  0x43   : > { %v685_v56 = vadd.f32 %v621_v46, %v493_v36  ;;  %v622_v57 = vmul.f32 100.0, %v558_v47  ;;  %v559_v58 = vmul.f32 %v431_v48, %v431_v48  ;;  %v496_v62 = vmul.f32 %v304_v45, %v304_v45  ;;  %v184_v48 = vld [vmem:[%s1200_s26 + $0xb0] sm:$0xff] }
  0x44   : > { %748 = vst [vmem:[%s1226_s17 + $0x48] sm:$0xff] %v684_v52  ;;  %v433_v63 = vsub.f32 %v915_v50, %v369_v55  ;;  %v306_v0 = vsub.f32 1.0, %v177_v51  ;;  %v370_v1 = vmul.f32 %v177_v51, %v177_v51  ;;  %v560_v4 = vmul.f32 %v432_v59, %v432_v59  ;;  %v922_v52 = vld [vmem:[%s1200_s26 + $0x2a8] sm:$0xff]  ;;  %v185_v59 = vld [vmem:[%s1200_s26 + $0xb8] sm:$0xff] }
  0x45   : > { %749 = vst [vmem:[%s1226_s17 + $0x50] sm:$0xff] %v685_v56  ;;  %v686_v2 = vadd.f32 %v622_v57, %v494_v43  ;;  %v623_v3 = vmul.f32 100.0, %v559_v58  ;;  %v307_v6 = vsub.f32 1.0, %v178_v61  ;;  %v497_v8 = vmul.f32 %v305_v54, %v305_v54  ;;  %v183_v43 = vld [vmem:[%s1200_s26 + $0xa8] sm:$0xff]  ;;  %v923_v58 = vld [vmem:[%s1200_s26 + $0x2b0] sm:$0xff] }
  0x46   : > { %v561_v9 = vmul.f32 %v433_v63, %v433_v63  ;;  %v434_v10 = vsub.f32 %v916_v60, %v370_v1  ;;  %v371_v11 = vmul.f32 %v178_v61, %v178_v61  ;;  %v624_v14 = vmul.f32 100.0, %v560_v4  ;;  %v924_v4 = vld [vmem:[%s1200_s26 + $0x2b8] sm:$0xff] }
  0x47   : > { %750 = vst [vmem:[%s1226_s17 + $0x58] sm:$0xff] %v686_v2  ;;  %v687_v13 = vadd.f32 %v623_v3, %v495_v53  ;;  %v498_v15 = vmul.f32 %v306_v0, %v306_v0  ;;  %v308_v17 = vsub.f32 1.0, %v179_v7  ;;  %v372_v21 = vmul.f32 %v179_v7, %v179_v7 }
  0x48   : > { %v625_v18 = vmul.f32 100.0, %v561_v9  ;;  %v562_v19 = vmul.f32 %v434_v10, %v434_v10  ;;  %v435_v20 = vsub.f32 %v917_v5, %v371_v11  ;;  %v688_v24 = vadd.f32 %v624_v14, %v496_v62  ;;  %v186_v5 = vld [vmem:[%s1200_s26 + $0xc0] sm:$0xff] }
  0x49   : > { %751 = vst [vmem:[%s1226_s17 + $0x60] sm:$0xff] %v687_v13  ;;  %v499_v25 = vmul.f32 %v307_v6, %v307_v6  ;;  %v309_v26 = vsub.f32 1.0, %v180_v12  ;;  %v373_v27 = vmul.f32 %v180_v12, %v180_v12  ;;  %v436_v31 = vsub.f32 %v918_v16, %v372_v21  ;;  %v925_v13 = vld [vmem:[%s1200_s26 + $0x2c0] sm:$0xff] }
  0x4a   : > { %v689_v28 = vadd.f32 %v625_v18, %v497_v8  ;;  %v626_v29 = vmul.f32 100.0, %v562_v19  ;;  %v563_v30 = vmul.f32 %v435_v20, %v435_v20  ;;  %752 = vst [vmem:[%s1226_s17 + $0x68] sm:$0xff] %v688_v24  ;;  %v500_v34 = vmul.f32 %v308_v17, %v308_v17  ;;  %v188_v20 = vld [vmem:[%s1200_s26 + $0xd0] sm:$0xff]  ;;  %v926_v24 = vld [vmem:[%s1200_s26 + $0x2c8] sm:$0xff] }
  0x4b   : > { %v437_v35 = vsub.f32 %v919_v22, %v373_v27  ;;  %v310_v36 = vsub.f32 1.0, %v181_v23  ;;  %v374_v37 = vmul.f32 %v181_v23, %v181_v23  ;;  %v564_v40 = vmul.f32 %v436_v31, %v436_v31  ;;  %v189_v31 = vld [vmem:[%s1200_s26 + $0xd8] sm:$0xff] }
  0x4c   : > { %753 = vst [vmem:[%s1226_s17 + $0x70] sm:$0xff] %v689_v28  ;;  %v690_v38 = vadd.f32 %v626_v29, %v498_v15  ;;  %v627_v39 = vmul.f32 100.0, %v563_v30  ;;  %v311_v42 = vsub.f32 1.0, %v182_v33  ;;  %v501_v44 = vmul.f32 %v309_v26, %v309_v26  ;;  %v187_v15 = vld [vmem:[%s1200_s26 + $0xc8] sm:$0xff]  ;;  %v927_v30 = vld [vmem:[%s1200_s26 + $0x2d0] sm:$0xff] }
  0x4d   : > { %v565_v45 = vmul.f32 %v437_v35, %v437_v35  ;;  %v438_v46 = vsub.f32 %v920_v32, %v374_v37  ;;  %v375_v47 = vmul.f32 %v182_v33, %v182_v33  ;;  %v628_v50 = vmul.f32 100.0, %v564_v40  ;;  %v928_v40 = vld [vmem:[%s1200_s26 + $0x2d8] sm:$0xff] }
  0x4e   : > { %754 = vst [vmem:[%s1226_s17 + $0x78] sm:$0xff] %v690_v38  ;;  %v691_v49 = vadd.f32 %v627_v39, %v499_v25  ;;  %v502_v51 = vmul.f32 %v310_v36, %v310_v36  ;;  %v312_v53 = vsub.f32 1.0, %v183_v43  ;;  %v376_v57 = vmul.f32 %v183_v43, %v183_v43 }
  0x4f   : > { %v629_v54 = vmul.f32 100.0, %v565_v45  ;;  %v566_v55 = vmul.f32 %v438_v46, %v438_v46  ;;  %v439_v56 = vsub.f32 %v921_v41, %v375_v47  ;;  %v692_v60 = vadd.f32 %v628_v50, %v500_v34  ;;  %v190_v41 = vld [vmem:[%s1200_s26 + $0xe0] sm:$0xff] }
  0x50   : > { %755 = vst [vmem:[%s1226_s17 + $0x80] sm:$0xff] %v691_v49  ;;  %v503_v61 = vmul.f32 %v311_v42, %v311_v42  ;;  %v313_v62 = vsub.f32 1.0, %v184_v48  ;;  %v377_v63 = vmul.f32 %v184_v48, %v184_v48  ;;  %v440_v3 = vsub.f32 %v922_v52, %v376_v57  ;;  %v929_v49 = vld [vmem:[%s1200_s26 + $0x2e0] sm:$0xff] }
  0x51   : > { %v693_v0 = vadd.f32 %v629_v54, %v501_v44  ;;  %v630_v1 = vmul.f32 100.0, %v566_v55  ;;  %v567_v2 = vmul.f32 %v439_v56, %v439_v56  ;;  %756 = vst [vmem:[%s1226_s17 + $0x88] sm:$0xff] %v692_v60  ;;  %v504_v6 = vmul.f32 %v312_v53, %v312_v53  ;;  %v192_v56 = vld [vmem:[%s1200_s26 + $0xf0] sm:$0xff]  ;;  %v930_v60 = vld [vmem:[%s1200_s26 + $0x2e8] sm:$0xff] }
  0x52   : > { %v441_v7 = vsub.f32 %v923_v58, %v377_v63  ;;  %v314_v8 = vsub.f32 1.0, %v185_v59  ;;  %v378_v9 = vmul.f32 %v185_v59, %v185_v59  ;;  %v568_v12 = vmul.f32 %v440_v3, %v440_v3  ;;  %v193_v3 = vld [vmem:[%s1200_s26 + $0xf8] sm:$0xff] }
  0x53   : > { %757 = vst [vmem:[%s1226_s17 + $0x90] sm:$0xff] %v693_v0  ;;  %v694_v10 = vadd.f32 %v630_v1, %v502_v51  ;;  %v631_v11 = vmul.f32 100.0, %v567_v2  ;;  %v315_v14 = vsub.f32 1.0, %v186_v5  ;;  %v505_v16 = vmul.f32 %v313_v62, %v313_v62  ;;  %v191_v51 = vld [vmem:[%s1200_s26 + $0xe8] sm:$0xff]  ;;  %v931_v2 = vld [vmem:[%s1200_s26 + $0x2f0] sm:$0xff] }
  0x54   : > { %v569_v17 = vmul.f32 %v441_v7, %v441_v7  ;;  %v442_v18 = vsub.f32 %v924_v4, %v378_v9  ;;  %v379_v19 = vmul.f32 %v186_v5, %v186_v5  ;;  %v632_v22 = vmul.f32 100.0, %v568_v12  ;;  %v932_v12 = vld [vmem:[%s1200_s26 + $0x2f8] sm:$0xff] }
  0x55   : > { %758 = vst [vmem:[%s1226_s17 + $0x98] sm:$0xff] %v694_v10  ;;  %v695_v21 = vadd.f32 %v631_v11, %v503_v61  ;;  %v506_v23 = vmul.f32 %v314_v8, %v314_v8  ;;  %v316_v25 = vsub.f32 1.0, %v187_v15  ;;  %v380_v29 = vmul.f32 %v187_v15, %v187_v15 }
  0x56   : > { %v633_v26 = vmul.f32 100.0, %v569_v17  ;;  %v570_v27 = vmul.f32 %v442_v18, %v442_v18  ;;  %v443_v28 = vsub.f32 %v925_v13, %v379_v19  ;;  %v696_v32 = vadd.f32 %v632_v22, %v504_v6  ;;  %v194_v13 = vld [vmem:[%s1200_s26 + $0x100] sm:$0xff] }
  0x57   : > { %759 = vst [vmem:[%s1226_s17 + $0xa0] sm:$0xff] %v695_v21  ;;  %v507_v33 = vmul.f32 %v315_v14, %v315_v14  ;;  %v317_v34 = vsub.f32 1.0, %v188_v20  ;;  %v381_v35 = vmul.f32 %v188_v20, %v188_v20  ;;  %v444_v39 = vsub.f32 %v926_v24, %v380_v29  ;;  %v933_v21 = vld [vmem:[%s1200_s26 + $0x300] sm:$0xff] }
  0x58   : > { %v697_v36 = vadd.f32 %v633_v26, %v505_v16  ;;  %v634_v37 = vmul.f32 100.0, %v570_v27  ;;  %v571_v38 = vmul.f32 %v443_v28, %v443_v28  ;;  %760 = vst [vmem:[%s1226_s17 + $0xa8] sm:$0xff] %v696_v32  ;;  %v508_v42 = vmul.f32 %v316_v25, %v316_v25  ;;  %v196_v28 = vld [vmem:[%s1200_s26 + $0x110] sm:$0xff]  ;;  %v934_v32 = vld [vmem:[%s1200_s26 + $0x308] sm:$0xff] }
  0x59   : > { %v445_v43 = vsub.f32 %v927_v30, %v381_v35  ;;  %v318_v44 = vsub.f32 1.0, %v189_v31  ;;  %v382_v45 = vmul.f32 %v189_v31, %v189_v31  ;;  %v572_v48 = vmul.f32 %v444_v39, %v444_v39  ;;  %v197_v39 = vld [vmem:[%s1200_s26 + $0x118] sm:$0xff] }
  0x5a   : > { %761 = vst [vmem:[%s1226_s17 + $0xb0] sm:$0xff] %v697_v36  ;;  %v698_v46 = vadd.f32 %v634_v37, %v506_v23  ;;  %v635_v47 = vmul.f32 100.0, %v571_v38  ;;  %v319_v50 = vsub.f32 1.0, %v190_v41  ;;  %v509_v52 = vmul.f32 %v317_v34, %v317_v34  ;;  %v195_v23 = vld [vmem:[%s1200_s26 + $0x108] sm:$0xff]  ;;  %v935_v38 = vld [vmem:[%s1200_s26 + $0x310] sm:$0xff] }
  0x5b   : > { %v573_v53 = vmul.f32 %v445_v43, %v445_v43  ;;  %v446_v54 = vsub.f32 %v928_v40, %v382_v45  ;;  %v383_v55 = vmul.f32 %v190_v41, %v190_v41  ;;  %v636_v58 = vmul.f32 100.0, %v572_v48  ;;  %v936_v48 = vld [vmem:[%s1200_s26 + $0x318] sm:$0xff] }
  0x5c   : > { %762 = vst [vmem:[%s1226_s17 + $0xb8] sm:$0xff] %v698_v46  ;;  %v699_v57 = vadd.f32 %v635_v47, %v507_v33  ;;  %v510_v59 = vmul.f32 %v318_v44, %v318_v44  ;;  %v320_v61 = vsub.f32 1.0, %v191_v51  ;;  %v384_v1 = vmul.f32 %v191_v51, %v191_v51 }
  0x5d   : > { %v637_v62 = vmul.f32 100.0, %v573_v53  ;;  %v574_v63 = vmul.f32 %v446_v54, %v446_v54  ;;  %v447_v0 = vsub.f32 %v929_v49, %v383_v55  ;;  %v700_v4 = vadd.f32 %v636_v58, %v508_v42  ;;  %v198_v49 = vld [vmem:[%s1200_s26 + $0x120] sm:$0xff] }
  0x5e   : > { %763 = vst [vmem:[%s1226_s17 + $0xc0] sm:$0xff] %v699_v57  ;;  %v511_v5 = vmul.f32 %v319_v50, %v319_v50  ;;  %v321_v6 = vsub.f32 1.0, %v192_v56  ;;  %v385_v7 = vmul.f32 %v192_v56, %v192_v56  ;;  %v448_v11 = vsub.f32 %v930_v60, %v384_v1  ;;  %v937_v57 = vld [vmem:[%s1200_s26 + $0x320] sm:$0xff] }
  0x5f   : > { %v701_v8 = vadd.f32 %v637_v62, %v509_v52  ;;  %v638_v9 = vmul.f32 100.0, %v574_v63  ;;  %v575_v10 = vmul.f32 %v447_v0, %v447_v0  ;;  %764 = vst [vmem:[%s1226_s17 + $0xc8] sm:$0xff] %v700_v4  ;;  %v512_v14 = vmul.f32 %v320_v61, %v320_v61  ;;  %v200_v0 = vld [vmem:[%s1200_s26 + $0x130] sm:$0xff]  ;;  %v938_v4 = vld [vmem:[%s1200_s26 + $0x328] sm:$0xff] }
  0x60   : > { %v449_v15 = vsub.f32 %v931_v2, %v385_v7  ;;  %v322_v16 = vsub.f32 1.0, %v193_v3  ;;  %v386_v17 = vmul.f32 %v193_v3, %v193_v3  ;;  %v576_v20 = vmul.f32 %v448_v11, %v448_v11  ;;  %v201_v11 = vld [vmem:[%s1200_s26 + $0x138] sm:$0xff] }
  0x61   : > { %765 = vst [vmem:[%s1226_s17 + $0xd0] sm:$0xff] %v701_v8  ;;  %v702_v18 = vadd.f32 %v638_v9, %v510_v59  ;;  %v639_v19 = vmul.f32 100.0, %v575_v10  ;;  %v323_v22 = vsub.f32 1.0, %v194_v13  ;;  %v513_v24 = vmul.f32 %v321_v6, %v321_v6  ;;  %v199_v59 = vld [vmem:[%s1200_s26 + $0x128] sm:$0xff]  ;;  %v939_v10 = vld [vmem:[%s1200_s26 + $0x330] sm:$0xff] }
  0x62   : > { %v577_v25 = vmul.f32 %v449_v15, %v449_v15  ;;  %v450_v26 = vsub.f32 %v932_v12, %v386_v17  ;;  %v387_v27 = vmul.f32 %v194_v13, %v194_v13  ;;  %v640_v30 = vmul.f32 100.0, %v576_v20  ;;  %v940_v20 = vld [vmem:[%s1200_s26 + $0x338] sm:$0xff] }
  0x63   : > { %766 = vst [vmem:[%s1226_s17 + $0xd8] sm:$0xff] %v702_v18  ;;  %v703_v29 = vadd.f32 %v639_v19, %v511_v5  ;;  %v514_v31 = vmul.f32 %v322_v16, %v322_v16  ;;  %v324_v33 = vsub.f32 1.0, %v195_v23  ;;  %v388_v37 = vmul.f32 %v195_v23, %v195_v23 }
  0x64   : > { %v641_v34 = vmul.f32 100.0, %v577_v25  ;;  %v578_v35 = vmul.f32 %v450_v26, %v450_v26  ;;  %v451_v36 = vsub.f32 %v933_v21, %v387_v27  ;;  %v704_v40 = vadd.f32 %v640_v30, %v512_v14  ;;  %v202_v21 = vld [vmem:[%s1200_s26 + $0x140] sm:$0xff] }
  0x65   : > { %767 = vst [vmem:[%s1226_s17 + $0xe0] sm:$0xff] %v703_v29  ;;  %v515_v41 = vmul.f32 %v323_v22, %v323_v22  ;;  %v325_v42 = vsub.f32 1.0, %v196_v28  ;;  %v389_v43 = vmul.f32 %v196_v28, %v196_v28  ;;  %v452_v47 = vsub.f32 %v934_v32, %v388_v37  ;;  %v941_v29 = vld [vmem:[%s1200_s26 + $0x340] sm:$0xff] }
  0x66   : > { %v705_v44 = vadd.f32 %v641_v34, %v513_v24  ;;  %v642_v45 = vmul.f32 100.0, %v578_v35  ;;  %v579_v46 = vmul.f32 %v451_v36, %v451_v36  ;;  %768 = vst [vmem:[%s1226_s17 + $0xe8] sm:$0xff] %v704_v40  ;;  %v516_v50 = vmul.f32 %v324_v33, %v324_v33  ;;  %v204_v36 = vld [vmem:[%s1200_s26 + $0x150] sm:$0xff]  ;;  %v942_v40 = vld [vmem:[%s1200_s26 + $0x348] sm:$0xff] }
  0x67   : > { %v453_v51 = vsub.f32 %v935_v38, %v389_v43  ;;  %v326_v52 = vsub.f32 1.0, %v197_v39  ;;  %v390_v53 = vmul.f32 %v197_v39, %v197_v39  ;;  %v580_v56 = vmul.f32 %v452_v47, %v452_v47  ;;  %v205_v47 = vld [vmem:[%s1200_s26 + $0x158] sm:$0xff] }
  0x68   : > { %769 = vst [vmem:[%s1226_s17 + $0xf0] sm:$0xff] %v705_v44  ;;  %v706_v54 = vadd.f32 %v642_v45, %v514_v31  ;;  %v643_v55 = vmul.f32 100.0, %v579_v46  ;;  %v327_v58 = vsub.f32 1.0, %v198_v49  ;;  %v517_v60 = vmul.f32 %v325_v42, %v325_v42  ;;  %v203_v31 = vld [vmem:[%s1200_s26 + $0x148] sm:$0xff]  ;;  %v943_v46 = vld [vmem:[%s1200_s26 + $0x350] sm:$0xff] }
  0x69   : > { %v581_v61 = vmul.f32 %v453_v51, %v453_v51  ;;  %v454_v62 = vsub.f32 %v936_v48, %v390_v53  ;;  %v391_v63 = vmul.f32 %v198_v49, %v198_v49  ;;  %v644_v2 = vmul.f32 100.0, %v580_v56  ;;  %v944_v56 = vld [vmem:[%s1200_s26 + $0x358] sm:$0xff] }
  0x6a   : > { %770 = vst [vmem:[%s1226_s17 + $0xf8] sm:$0xff] %v706_v54  ;;  %v707_v1 = vadd.f32 %v643_v55, %v515_v41  ;;  %v518_v3 = vmul.f32 %v326_v52, %v326_v52  ;;  %v328_v5 = vsub.f32 1.0, %v199_v59  ;;  %v392_v9 = vmul.f32 %v199_v59, %v199_v59 }
  0x6b   : > { %v645_v6 = vmul.f32 100.0, %v581_v61  ;;  %v582_v7 = vmul.f32 %v454_v62, %v454_v62  ;;  %v455_v8 = vsub.f32 %v937_v57, %v391_v63  ;;  %v708_v12 = vadd.f32 %v644_v2, %v516_v50  ;;  %v206_v57 = vld [vmem:[%s1200_s26 + $0x160] sm:$0xff] }
  0x6c   : > { %771 = vst [vmem:[%s1226_s17 + $0x100] sm:$0xff] %v707_v1  ;;  %v519_v13 = vmul.f32 %v327_v58, %v327_v58  ;;  %v329_v14 = vsub.f32 1.0, %v200_v0  ;;  %v393_v15 = vmul.f32 %v200_v0, %v200_v0  ;;  %v456_v19 = vsub.f32 %v938_v4, %v392_v9  ;;  %v945_v1 = vld [vmem:[%s1200_s26 + $0x360] sm:$0xff] }
  0x6d   : > { %v709_v16 = vadd.f32 %v645_v6, %v517_v60  ;;  %v646_v17 = vmul.f32 100.0, %v582_v7  ;;  %v583_v18 = vmul.f32 %v455_v8, %v455_v8  ;;  %772 = vst [vmem:[%s1226_s17 + $0x108] sm:$0xff] %v708_v12  ;;  %v520_v22 = vmul.f32 %v328_v5, %v328_v5  ;;  %v208_v8 = vld [vmem:[%s1200_s26 + $0x170] sm:$0xff]  ;;  %v946_v12 = vld [vmem:[%s1200_s26 + $0x368] sm:$0xff] }
  0x6e   : > { %v457_v23 = vsub.f32 %v939_v10, %v393_v15  ;;  %v330_v24 = vsub.f32 1.0, %v201_v11  ;;  %v394_v25 = vmul.f32 %v201_v11, %v201_v11  ;;  %v584_v28 = vmul.f32 %v456_v19, %v456_v19  ;;  %v209_v19 = vld [vmem:[%s1200_s26 + $0x178] sm:$0xff] }
  0x6f   : > { %773 = vst [vmem:[%s1226_s17 + $0x110] sm:$0xff] %v709_v16  ;;  %v710_v26 = vadd.f32 %v646_v17, %v518_v3  ;;  %v647_v27 = vmul.f32 100.0, %v583_v18  ;;  %v331_v30 = vsub.f32 1.0, %v202_v21  ;;  %v521_v32 = vmul.f32 %v329_v14, %v329_v14  ;;  %v207_v3 = vld [vmem:[%s1200_s26 + $0x168] sm:$0xff]  ;;  %v947_v18 = vld [vmem:[%s1200_s26 + $0x370] sm:$0xff] }
  0x70   : > { %v585_v33 = vmul.f32 %v457_v23, %v457_v23  ;;  %v458_v34 = vsub.f32 %v940_v20, %v394_v25  ;;  %v395_v35 = vmul.f32 %v202_v21, %v202_v21  ;;  %v648_v38 = vmul.f32 100.0, %v584_v28  ;;  %v948_v28 = vld [vmem:[%s1200_s26 + $0x378] sm:$0xff] }
  0x71   : > { %774 = vst [vmem:[%s1226_s17 + $0x118] sm:$0xff] %v710_v26  ;;  %v711_v37 = vadd.f32 %v647_v27, %v519_v13  ;;  %v522_v39 = vmul.f32 %v330_v24, %v330_v24  ;;  %v332_v41 = vsub.f32 1.0, %v203_v31  ;;  %v396_v45 = vmul.f32 %v203_v31, %v203_v31 }
  0x72   : > { %v649_v42 = vmul.f32 100.0, %v585_v33  ;;  %v586_v43 = vmul.f32 %v458_v34, %v458_v34  ;;  %v459_v44 = vsub.f32 %v941_v29, %v395_v35  ;;  %v712_v48 = vadd.f32 %v648_v38, %v520_v22  ;;  %v210_v29 = vld [vmem:[%s1200_s26 + $0x180] sm:$0xff] }
  0x73   : > { %775 = vst [vmem:[%s1226_s17 + $0x120] sm:$0xff] %v711_v37  ;;  %v523_v49 = vmul.f32 %v331_v30, %v331_v30  ;;  %v333_v50 = vsub.f32 1.0, %v204_v36  ;;  %v397_v51 = vmul.f32 %v204_v36, %v204_v36  ;;  %v460_v55 = vsub.f32 %v942_v40, %v396_v45  ;;  %v949_v37 = vld [vmem:[%s1200_s26 + $0x380] sm:$0xff] }
  0x74   : > { %v713_v52 = vadd.f32 %v649_v42, %v521_v32  ;;  %v650_v53 = vmul.f32 100.0, %v586_v43  ;;  %v587_v54 = vmul.f32 %v459_v44, %v459_v44  ;;  %776 = vst [vmem:[%s1226_s17 + $0x128] sm:$0xff] %v712_v48  ;;  %v524_v58 = vmul.f32 %v332_v41, %v332_v41  ;;  %v212_v44 = vld [vmem:[%s1200_s26 + $0x190] sm:$0xff]  ;;  %v950_v48 = vld [vmem:[%s1200_s26 + $0x388] sm:$0xff] }
  0x75   : > { %v461_v59 = vsub.f32 %v943_v46, %v397_v51  ;;  %v334_v60 = vsub.f32 1.0, %v205_v47  ;;  %v398_v61 = vmul.f32 %v205_v47, %v205_v47  ;;  %v588_v0 = vmul.f32 %v460_v55, %v460_v55  ;;  %v213_v55 = vld [vmem:[%s1200_s26 + $0x198] sm:$0xff] }
  0x76   : > { %777 = vst [vmem:[%s1226_s17 + $0x130] sm:$0xff] %v713_v52  ;;  %v714_v62 = vadd.f32 %v650_v53, %v522_v39  ;;  %v651_v63 = vmul.f32 100.0, %v587_v54  ;;  %v335_v2 = vsub.f32 1.0, %v206_v57  ;;  %v525_v4 = vmul.f32 %v333_v50, %v333_v50  ;;  %v211_v39 = vld [vmem:[%s1200_s26 + $0x188] sm:$0xff]  ;;  %v951_v54 = vld [vmem:[%s1200_s26 + $0x390] sm:$0xff] }
  0x77   : > { %v589_v5 = vmul.f32 %v461_v59, %v461_v59  ;;  %v462_v6 = vsub.f32 %v944_v56, %v398_v61  ;;  %v399_v7 = vmul.f32 %v206_v57, %v206_v57  ;;  %v652_v10 = vmul.f32 100.0, %v588_v0  ;;  %v952_v0 = vld [vmem:[%s1200_s26 + $0x398] sm:$0xff] }
  0x78   : > { %778 = vst [vmem:[%s1226_s17 + $0x138] sm:$0xff] %v714_v62  ;;  %v715_v9 = vadd.f32 %v651_v63, %v523_v49  ;;  %v526_v11 = vmul.f32 %v334_v60, %v334_v60  ;;  %v336_v13 = vsub.f32 1.0, %v207_v3  ;;  %v400_v17 = vmul.f32 %v207_v3, %v207_v3 }
  0x79   : > { %v653_v14 = vmul.f32 100.0, %v589_v5  ;;  %v590_v15 = vmul.f32 %v462_v6, %v462_v6  ;;  %v463_v16 = vsub.f32 %v945_v1, %v399_v7  ;;  %v716_v20 = vadd.f32 %v652_v10, %v524_v58  ;;  %v214_v1 = vld [vmem:[%s1200_s26 + $0x1a0] sm:$0xff] }
  0x7a   : > { %779 = vst [vmem:[%s1226_s17 + $0x140] sm:$0xff] %v715_v9  ;;  %v527_v21 = vmul.f32 %v335_v2, %v335_v2  ;;  %v337_v22 = vsub.f32 1.0, %v208_v8  ;;  %v401_v23 = vmul.f32 %v208_v8, %v208_v8  ;;  %v464_v27 = vsub.f32 %v946_v12, %v400_v17  ;;  %v953_v9 = vld [vmem:[%s1200_s26 + $0x3a0] sm:$0xff] }
  0x7b   : > { %v717_v24 = vadd.f32 %v653_v14, %v525_v4  ;;  %v654_v25 = vmul.f32 100.0, %v590_v15  ;;  %v591_v26 = vmul.f32 %v463_v16, %v463_v16  ;;  %780 = vst [vmem:[%s1226_s17 + $0x148] sm:$0xff] %v716_v20  ;;  %v528_v30 = vmul.f32 %v336_v13, %v336_v13  ;;  %v216_v16 = vld [vmem:[%s1200_s26 + $0x1b0] sm:$0xff]  ;;  %v954_v20 = vld [vmem:[%s1200_s26 + $0x3a8] sm:$0xff] }
  0x7c   : > { %v465_v31 = vsub.f32 %v947_v18, %v401_v23  ;;  %v338_v32 = vsub.f32 1.0, %v209_v19  ;;  %v402_v33 = vmul.f32 %v209_v19, %v209_v19  ;;  %v592_v36 = vmul.f32 %v464_v27, %v464_v27  ;;  %v217_v27 = vld [vmem:[%s1200_s26 + $0x1b8] sm:$0xff] }
  0x7d   : > { %781 = vst [vmem:[%s1226_s17 + $0x150] sm:$0xff] %v717_v24  ;;  %v718_v34 = vadd.f32 %v654_v25, %v526_v11  ;;  %v655_v35 = vmul.f32 100.0, %v591_v26  ;;  %v339_v38 = vsub.f32 1.0, %v210_v29  ;;  %v529_v40 = vmul.f32 %v337_v22, %v337_v22  ;;  %v215_v11 = vld [vmem:[%s1200_s26 + $0x1a8] sm:$0xff]  ;;  %v955_v26 = vld [vmem:[%s1200_s26 + $0x3b0] sm:$0xff] }
  0x7e   : > { %v593_v41 = vmul.f32 %v465_v31, %v465_v31  ;;  %v466_v42 = vsub.f32 %v948_v28, %v402_v33  ;;  %v403_v43 = vmul.f32 %v210_v29, %v210_v29  ;;  %v656_v46 = vmul.f32 100.0, %v592_v36  ;;  %v956_v36 = vld [vmem:[%s1200_s26 + $0x3b8] sm:$0xff] }
  0x7f   : > { %782 = vst [vmem:[%s1226_s17 + $0x158] sm:$0xff] %v718_v34  ;;  %v719_v45 = vadd.f32 %v655_v35, %v527_v21  ;;  %v530_v47 = vmul.f32 %v338_v32, %v338_v32  ;;  %v340_v49 = vsub.f32 1.0, %v211_v39  ;;  %v404_v53 = vmul.f32 %v211_v39, %v211_v39 }
  0x80   : > { %v657_v50 = vmul.f32 100.0, %v593_v41  ;;  %v594_v51 = vmul.f32 %v466_v42, %v466_v42  ;;  %v467_v52 = vsub.f32 %v949_v37, %v403_v43  ;;  %v720_v56 = vadd.f32 %v656_v46, %v528_v30  ;;  %v218_v37 = vld [vmem:[%s1200_s26 + $0x1c0] sm:$0xff] }
  0x81   : > { %783 = vst [vmem:[%s1226_s17 + $0x160] sm:$0xff] %v719_v45  ;;  %v531_v57 = vmul.f32 %v339_v38, %v339_v38  ;;  %v341_v58 = vsub.f32 1.0, %v212_v44  ;;  %v405_v59 = vmul.f32 %v212_v44, %v212_v44  ;;  %v468_v63 = vsub.f32 %v950_v48, %v404_v53  ;;  %v957_v45 = vld [vmem:[%s1200_s26 + $0x3c0] sm:$0xff] }
  0x82   : > { %v721_v60 = vadd.f32 %v657_v50, %v529_v40  ;;  %v658_v61 = vmul.f32 100.0, %v594_v51  ;;  %v595_v62 = vmul.f32 %v467_v52, %v467_v52  ;;  %784 = vst [vmem:[%s1226_s17 + $0x168] sm:$0xff] %v720_v56  ;;  %v532_v2 = vmul.f32 %v340_v49, %v340_v49  ;;  %v220_v52 = vld [vmem:[%s1200_s26 + $0x1d0] sm:$0xff]  ;;  %v958_v56 = vld [vmem:[%s1200_s26 + $0x3c8] sm:$0xff] }
  0x83   : > { %v469_v3 = vsub.f32 %v951_v54, %v405_v59  ;;  %v342_v4 = vsub.f32 1.0, %v213_v55  ;;  %v406_v5 = vmul.f32 %v213_v55, %v213_v55  ;;  %v596_v8 = vmul.f32 %v468_v63, %v468_v63  ;;  %v221_v63 = vld [vmem:[%s1200_s26 + $0x1d8] sm:$0xff] }
  0x84   : > { %785 = vst [vmem:[%s1226_s17 + $0x170] sm:$0xff] %v721_v60  ;;  %v722_v6 = vadd.f32 %v658_v61, %v530_v47  ;;  %v659_v7 = vmul.f32 100.0, %v595_v62  ;;  %v343_v10 = vsub.f32 1.0, %v214_v1  ;;  %v533_v12 = vmul.f32 %v341_v58, %v341_v58  ;;  %v219_v47 = vld [vmem:[%s1200_s26 + $0x1c8] sm:$0xff]  ;;  %v959_v62 = vld [vmem:[%s1200_s26 + $0x3d0] sm:$0xff] }
  0x85   : > { %v597_v13 = vmul.f32 %v469_v3, %v469_v3  ;;  %v470_v14 = vsub.f32 %v952_v0, %v406_v5  ;;  %v407_v15 = vmul.f32 %v214_v1, %v214_v1  ;;  %v660_v18 = vmul.f32 100.0, %v596_v8  ;;  %v960_v8 = vld [vmem:[%s1200_s26 + $0x3d8] sm:$0xff] }
  0x86   : > { %786 = vst [vmem:[%s1226_s17 + $0x178] sm:$0xff] %v722_v6  ;;  %v723_v17 = vadd.f32 %v659_v7, %v531_v57  ;;  %v534_v19 = vmul.f32 %v342_v4, %v342_v4  ;;  %v344_v21 = vsub.f32 1.0, %v215_v11  ;;  %v408_v25 = vmul.f32 %v215_v11, %v215_v11 }
  0x87   : > { %v661_v22 = vmul.f32 100.0, %v597_v13  ;;  %v598_v23 = vmul.f32 %v470_v14, %v470_v14  ;;  %v471_v24 = vsub.f32 %v953_v9, %v407_v15  ;;  %v724_v28 = vadd.f32 %v660_v18, %v532_v2  ;;  %v222_v9 = vld [vmem:[%s1200_s26 + $0x1e0] sm:$0xff] }
  0x88   : > { %787 = vst [vmem:[%s1226_s17 + $0x180] sm:$0xff] %v723_v17  ;;  %v535_v29 = vmul.f32 %v343_v10, %v343_v10  ;;  %v345_v30 = vsub.f32 1.0, %v216_v16  ;;  %v409_v31 = vmul.f32 %v216_v16, %v216_v16  ;;  %v472_v35 = vsub.f32 %v954_v20, %v408_v25  ;;  %v961_v17 = vld [vmem:[%s1200_s26 + $0x3e0] sm:$0xff] }
  0x89   : > { %v725_v32 = vadd.f32 %v661_v22, %v533_v12  ;;  %v662_v33 = vmul.f32 100.0, %v598_v23  ;;  %v599_v34 = vmul.f32 %v471_v24, %v471_v24  ;;  %788 = vst [vmem:[%s1226_s17 + $0x188] sm:$0xff] %v724_v28  ;;  %v536_v38 = vmul.f32 %v344_v21, %v344_v21  ;;  %v224_v24 = vld [vmem:[%s1200_s26 + $0x1f0] sm:$0xff]  ;;  %v962_v28 = vld [vmem:[%s1200_s26 + $0x3e8] sm:$0xff] }
  0x8a   : > { %v473_v39 = vsub.f32 %v955_v26, %v409_v31  ;;  %v346_v40 = vsub.f32 1.0, %v217_v27  ;;  %v410_v41 = vmul.f32 %v217_v27, %v217_v27  ;;  %v600_v44 = vmul.f32 %v472_v35, %v472_v35  ;;  %v225_v35 = vld [vmem:[%s1200_s26 + $0x1f8] sm:$0xff] }
  0x8b   : > { %789 = vst [vmem:[%s1226_s17 + $0x190] sm:$0xff] %v725_v32  ;;  %v726_v42 = vadd.f32 %v662_v33, %v534_v19  ;;  %v663_v43 = vmul.f32 100.0, %v599_v34  ;;  %v347_v46 = vsub.f32 1.0, %v218_v37  ;;  %v537_v48 = vmul.f32 %v345_v30, %v345_v30  ;;  %v223_v19 = vld [vmem:[%s1200_s26 + $0x1e8] sm:$0xff]  ;;  %v963_v34 = vld [vmem:[%s1200_s26 + $0x3f0] sm:$0xff] }
  0x8c   : > { %v601_v49 = vmul.f32 %v473_v39, %v473_v39  ;;  %v474_v50 = vsub.f32 %v956_v36, %v410_v41  ;;  %v411_v51 = vmul.f32 %v218_v37, %v218_v37  ;;  %v664_v54 = vmul.f32 100.0, %v600_v44  ;;  %v964_v44 = vld [vmem:[%s1200_s26 + $0x3f8] sm:$0xff] }
  0x8d   : > { %790 = vst [vmem:[%s1226_s17 + $0x198] sm:$0xff] %v726_v42  ;;  %v727_v53 = vadd.f32 %v663_v43, %v535_v29  ;;  %v538_v55 = vmul.f32 %v346_v40, %v346_v40  ;;  %v348_v57 = vsub.f32 1.0, %v219_v47  ;;  %v412_v61 = vmul.f32 %v219_v47, %v219_v47 }
  0x8e   : > { %v665_v58 = vmul.f32 100.0, %v601_v49  ;;  %v602_v59 = vmul.f32 %v474_v50, %v474_v50  ;;  %v475_v60 = vsub.f32 %v957_v45, %v411_v51  ;;  %v728_v0 = vadd.f32 %v664_v54, %v536_v38 }
  0x8f   : > { %791 = vst [vmem:[%s1226_s17 + $0x1a0] sm:$0xff] %v727_v53  ;;  %v539_v1 = vmul.f32 %v347_v46, %v347_v46  ;;  %v349_v2 = vsub.f32 1.0, %v220_v52  ;;  %v413_v3 = vmul.f32 %v220_v52, %v220_v52  ;;  %v476_v7 = vsub.f32 %v958_v56, %v412_v61 }
  0x90   : > { %v729_v4 = vadd.f32 %v665_v58, %v537_v48  ;;  %v666_v5 = vmul.f32 100.0, %v602_v59  ;;  %v603_v6 = vmul.f32 %v475_v60, %v475_v60  ;;  %792 = vst [vmem:[%s1226_s17 + $0x1a8] sm:$0xff] %v728_v0  ;;  %v540_v10 = vmul.f32 %v348_v57, %v348_v57 }
  0x91   : > { %v477_v11 = vsub.f32 %v959_v62, %v413_v3  ;;  %v350_v12 = vsub.f32 1.0, %v221_v63  ;;  %v414_v13 = vmul.f32 %v221_v63, %v221_v63  ;;  %v604_v16 = vmul.f32 %v476_v7, %v476_v7 }
  0x92   : > { %793 = vst [vmem:[%s1226_s17 + $0x1b0] sm:$0xff] %v729_v4  ;;  %v730_v14 = vadd.f32 %v666_v5, %v538_v55  ;;  %v667_v15 = vmul.f32 100.0, %v603_v6  ;;  %v351_v18 = vsub.f32 1.0, %v222_v9  ;;  %v541_v20 = vmul.f32 %v349_v2, %v349_v2 }
  0x93   : > { %v605_v21 = vmul.f32 %v477_v11, %v477_v11  ;;  %v478_v22 = vsub.f32 %v960_v8, %v414_v13  ;;  %v415_v23 = vmul.f32 %v222_v9, %v222_v9  ;;  %v668_v26 = vmul.f32 100.0, %v604_v16 }
  0x94   : > { %794 = vst [vmem:[%s1226_s17 + $0x1b8] sm:$0xff] %v730_v14  ;;  %v731_v25 = vadd.f32 %v667_v15, %v539_v1  ;;  %v542_v27 = vmul.f32 %v350_v12, %v350_v12  ;;  %v352_v29 = vsub.f32 1.0, %v223_v19  ;;  %v416_v33 = vmul.f32 %v223_v19, %v223_v19 }
  0x95   : > { %v669_v30 = vmul.f32 100.0, %v605_v21  ;;  %v606_v31 = vmul.f32 %v478_v22, %v478_v22  ;;  %v479_v32 = vsub.f32 %v961_v17, %v415_v23  ;;  %v732_v36 = vadd.f32 %v668_v26, %v540_v10 }
  0x96   : > { %795 = vst [vmem:[%s1226_s17 + $0x1c0] sm:$0xff] %v731_v25  ;;  %v543_v37 = vmul.f32 %v351_v18, %v351_v18  ;;  %v353_v38 = vsub.f32 1.0, %v224_v24  ;;  %v417_v39 = vmul.f32 %v224_v24, %v224_v24  ;;  %v480_v43 = vsub.f32 %v962_v28, %v416_v33 }
  0x97   : > { %v733_v40 = vadd.f32 %v669_v30, %v541_v20  ;;  %v670_v41 = vmul.f32 100.0, %v606_v31  ;;  %v607_v42 = vmul.f32 %v479_v32, %v479_v32  ;;  %796 = vst [vmem:[%s1226_s17 + $0x1c8] sm:$0xff] %v732_v36  ;;  %v354_v46 = vsub.f32 1.0, %v225_v35 }
  0x98   : > { %v481_v45 = vsub.f32 %v963_v34, %v417_v39  ;;  %v418_v47 = vmul.f32 %v225_v35, %v225_v35  ;;  %v544_v50 = vmul.f32 %v352_v29, %v352_v29  ;;  %v608_v51 = vmul.f32 %v480_v43, %v480_v43 }
  0x99   : > { %797 = vst [vmem:[%s1226_s17 + $0x1d0] sm:$0xff] %v733_v40  ;;  %v734_v48 = vadd.f32 %v670_v41, %v542_v27  ;;  %v671_v49 = vmul.f32 100.0, %v607_v42  ;;  %v545_v52 = vmul.f32 %v353_v38, %v353_v38  ;;  %v546_v58 = vmul.f32 %v354_v46, %v354_v46 }
  0x9a   : > { %v609_v53 = vmul.f32 %v481_v45, %v481_v45  ;;  %v482_v54 = vsub.f32 %v964_v44, %v418_v47  ;;  %v672_v56 = vmul.f32 100.0, %v608_v51 }
  0x9b   : > { %798 = vst [vmem:[%s1226_s17 + $0x1d8] sm:$0xff] %v734_v48  ;;  %v735_v55 = vadd.f32 %v671_v49, %v543_v37 }
  0x9c   : > { %v673_v57 = vmul.f32 100.0, %v609_v53  ;;  %v610_v59 = vmul.f32 %v482_v54, %v482_v54  ;;  %v736_v60 = vadd.f32 %v672_v56, %v544_v50 }
  0x9d   : > { %799 = vst [vmem:[%s1226_s17 + $0x1e0] sm:$0xff] %v735_v55 }
  0x9e   : > { %v737_v61 = vadd.f32 %v673_v57, %v545_v52  ;;  %v674_v62 = vmul.f32 100.0, %v610_v59  ;;  %800 = vst [vmem:[%s1226_s17 + $0x1e8] sm:$0xff] %v736_v60 }
  0xa0   : > { %801 = vst [vmem:[%s1226_s17 + $0x1f0] sm:$0xff] %v737_v61  ;;  %v738_v63 = vadd.f32 %v674_v62, %v546_v58 }
  0xa2   : > { %802 = vst [vmem:[%s1226_s17 + $0x1f8] sm:$0xff] %v738_v63 }
  0xa3   : > { %1041 = shalt.err (!%p1038_p7)
}
  0xa4   : > { %s1042_s5 = scalar_lea.hbm %s1406_s29, 8192  ;;  %s1046_s14 = scalar_lea.hbm %s1454_s1, 16384 }
  0xa5   : > { %p1043_p8 = scmp.ne.s32.totalorder %s1406_s29, %s1042_s5  ;;  %p1047_p0 = scmp.lt.s32.totalorder %s1406_s29, %s1454_s1 }
  0xa6   : > { %p1048_p1 = scmp.lt.s32.totalorder %s1046_s14, %s1042_s5 }
  0xa7   : > { %p1044_p12 = pnand %p1043_p8, %p1161_p9 }
  0xa8   : > { %p1049_p2 = por %p1048_p1, %p1047_p0 }
  0xa9   : > { %p1045_p13 = pneg %p1044_p12 }
  0xab   : > { %p1050_p3 = pnand %p1049_p2, %p1045_p13 }
  0xad   : > { %1053 = shalt.err (!%p1050_p3)
}
  0xae   : > { %s1101_s24 = smov 128   ;;  %s1102_s26 = smov 8  }
  0xaf   : > { %981 = dma.vmem_to_hbm [thread:$0]  (%p1161_p9), %s1408_s25, 8192, %s1406_s29, %s804_s10, %s1101_s24, %s1101_s24, %s1102_s26  }
  0xb0 PF: > { %s832_s16 = sand.u32 1, %s1080_s6   ;;  %p984_p4 = pnand %p892_p11, %p1165_p10 }
  0xb1   : > { %s833_s17 = scalar_lea.sflag [#allocation4], %s832_s16 }
  0xb2   : > { %p985_p5 = pneg %p984_p4 }
  0xb4   : > { %1075 = dma.done.wait (%p985_p5), %s833_s17, 8192  }
  0xb5   : > { %1077 = vsyncadd (%p985_p5), %s833_s17, 4294959104  ;;  %p14_p6 = scmp.ge.s32.totalorder %s1138_s12, 4   ;;  %s1459_s6 = smov %s1084_s7 }
  0xb6   : > { %s1460_s7 = smov %s1088_s8  ;;  %s1461_s8 = smov %s1150_s15 }
  0xb7   : > { %s1462_s9 = smov %s1138_s12  ;;  %16 = sbr.rel (!%p14_p6) target bundleno = 5 (0x5), region = 75 }
  0xbc   :  { %838 = vsyncpa [#allocation3], 1 }
  0xbd   :  { %840 = vsyncpa [#allocation3 + $0x1], 1 }
  0xbe   :  { %841 = vsyncpa [#allocation4], 1 }
  0xbf   :  { %843 = vsyncpa [#allocation4 + $0x1], 1 }

</bundles_post_ra>
